<compile_context>
chip_gen: v7x
topology: tpu7x:2x2x1
jax: 0.10.0
libtpu: 0.0.40
codegen_flags: <defaults>
</compile_context>

<pallas_src>
from functools import partial

import jax
import jax.numpy as jnp
from jax import lax
from jax.experimental import pallas as pl
from jax.experimental.pallas import tpu as pltpu


# ---------------- fused Pallas kernel ----------------

def _fused_attention_kernel(
    heads, dim_head, exp_bf16,
    xq_ref, xkv_ref, wq_ref, wkv_ref, wo_ref, b_ref,   # inputs
    o_ref,                                             # output
    q_sc, m_sc, l_sc, acc_sc,                          # VMEM scratch
):
    """One (batch, q-tile, kv-tile) step of fused QKV-proj + flash attention + out-proj.

    xq_ref : (1, TQ, C)  bf16 x rows for this q tile (channels-last)
    xkv_ref: (1, TK, C)  bf16 x rows for this kv tile
    wq_ref : (C, h_dim)      bf16 Q projection (1/sqrt(d) folded in), head-major lanes
    wkv_ref: (C, 2*h_dim)    bf16 [K | V] projection, head-major lanes per half
    wo_ref : (h_dim, C)      bf16 output projection
    b_ref  : (1, C)          f32 output bias
    o_ref  : (1, TQ, C)      output tile (resident across the kv axis)
    q_sc   : (TQ, h_dim) bf16   cached lane-concatenated q tile
    m_sc   : (TQ, heads) f32    online-softmax running max (one lane per head)
    l_sc   : (TQ, heads) f32    online-softmax running sum
    acc_sc : (TQ, h_dim) f32    online-softmax running accumulator (lane-dense)
    """
    ki = pl.program_id(2)
    nk = pl.num_programs(2)
    d = dim_head
    h_dim = heads * dim_head

    # ---- init per (batch, q-tile): one full-width Q matmul, reset softmax state
    @pl.when(ki == 0)
    def _():
        q_sc[...] = jnp.dot(xq_ref[0], wq_ref[...],
                            preferred_element_type=jnp.float32).astype(jnp.bfloat16)
        m_sc[...] = jnp.full_like(m_sc, -jnp.inf)
        l_sc[...] = jnp.zeros_like(l_sc)
        acc_sc[...] = jnp.zeros_like(acc_sc)

    # ---- one kv tile: K|V projected on-chip with a single lane-dense matmul
    kv = jnp.dot(xkv_ref[0], wkv_ref[...],
                 preferred_element_type=jnp.float32).astype(jnp.bfloat16)   # (TK, 2*h_dim)
    q = q_sc[...]                                                           # (TQ, h_dim)
    m_prev = m_sc[...]                                                      # (TQ, heads)
    l_prev = l_sc[...]

    m_cols, l_cols, a_cols, pv_cols = [], [], [], []
    for h in range(heads):
        q_h = q[:, h * d:(h + 1) * d]                                       # (TQ, d)
        k_h = kv[:, h * d:(h + 1) * d]                                      # (TK, d)
        v_h = kv[:, h_dim + h * d: h_dim + (h + 1) * d]                     # (TK, d)
        # s[i, j] = sum_d q[i, d] * k[j, d]   (q already carries 1/sqrt(d) scale)
        s = lax.dot_general(q_h, k_h, (((1,), (1,)), ((), ())),
                            preferred_element_type=jnp.float32)             # (TQ, TK)
        m_p = m_prev[:, h:h + 1]                                            # (TQ, 1)
        m_n = jnp.maximum(m_p, jnp.max(s, axis=-1, keepdims=True))
        alpha = jnp.exp(m_p - m_n)
        diff = s - m_n
        if exp_bf16:
            # EUP bf16 exp (~2x on v6e/v7x); running sum/acc stay f32.
            p = jnp.exp(diff.astype(jnp.bfloat16))
        else:
            p = jnp.exp(diff)
        l_n = alpha * l_prev[:, h:h + 1] + jnp.sum(
            p.astype(jnp.float32), axis=-1, keepdims=True)
        pv = jnp.dot(p.astype(jnp.bfloat16), v_h,
                     preferred_element_type=jnp.float32)                    # (TQ, d)
        m_cols.append(m_n)
        l_cols.append(l_n)
        a_cols.append(alpha)
        pv_cols.append(pv)

    # full-width (lane-dense) scratch updates -- no per-head masked stores
    m_sc[...] = jnp.concatenate(m_cols, axis=-1)                            # (TQ, heads)
    l_sc[...] = jnp.concatenate(l_cols, axis=-1)
    alpha_full = jnp.concatenate(
        [jnp.broadcast_to(a, (a.shape[0], d)) for a in a_cols], axis=-1)    # (TQ, h_dim)
    acc_sc[...] = alpha_full * acc_sc[...] + jnp.concatenate(pv_cols, axis=-1)

    # ---- finalize: softmax normalization fused with one full-depth out-proj (+bias)
    @pl.when(ki == nk - 1)
    def _():
        inv_l = pl.reciprocal(l_sc[...], approx=True)                       # (TQ, heads)
        inv_full = jnp.concatenate(
            [jnp.broadcast_to(inv_l[:, h:h + 1], (inv_l.shape[0], d))
             for h in range(heads)], axis=-1)                               # (TQ, h_dim)
        o_norm = (acc_sc[...] * inv_full).astype(jnp.bfloat16)              # (TQ, h_dim)
        y = jnp.dot(o_norm, wo_ref[...],
                    preferred_element_type=jnp.float32)                     # (TQ, C)
        o_ref[0] = (y + b_ref[...].astype(jnp.float32)).astype(o_ref.dtype)


# ---------------- parameter prep (one-time, outside the kernel) ----------------

def prepare_attention_params(w_qkv, w_out, b_out, *, heads, dim_head):
    """Fold the 1/sqrt(d) scale into Wq, lane-concatenate [K|V], cast to bf16.

    w_qkv: (C, 3*h_dim)  == to_qkv.weight[..., 0].T, columns ordered [q|k|v],
           each block laid out head-major (heads*dim_head, PyTorch channel order).
    w_out: (h_dim, C)    == to_out.weight[..., 0].T
    b_out: (C,)
    """
    C = w_qkv.shape[0]
    scale = dim_head ** (-0.5)
    wq, wk, wv = jnp.split(w_qkv, 3, axis=1)                  # each (C, h_dim)
    wq = (wq * scale).astype(jnp.bfloat16)                    # (C, h_dim), scale folded
    wkv = jnp.concatenate([wk, wv], axis=1).astype(jnp.bfloat16)   # (C, 2*h_dim)
    wo = w_out.astype(jnp.bfloat16)                           # (h_dim, C)
    b = b_out.reshape(1, C).astype(jnp.float32)
    return wq, wkv, wo, b


# ---------------- wrapper ----------------

def _pick_q_tile(L, N, candidates=(512, 256, 128)):
    divs = [t for t in candidates if L >= t and L % t == 0]
    if not divs:
        return L
    if N == 1:
        # v7x: 2 TensorCores shard the parallel axes -> prefer an even tile count
        for t in divs:
            if (L // t) % 2 == 0:
                return t
    return divs[0]


def _pick_kv_tile(L, candidates=(256, 128)):
    for t in candidates:
        if L >= t and L % t == 0:
            return t
    return L


def _vmem_limit_bytes(C, TQ, TK, heads, dim_head):
    """Footprint-based scoped-VMEM request (>= default limit, <= v7x physical)."""
    h_dim = heads * dim_head
    bf16, f32 = 2, 4
    blocks = 2 * (TQ * C * bf16 + TK * C * bf16) + 2 * TQ * C * f32   # double-buffered tiles
    weights = C * h_dim * bf16 + C * 2 * h_dim * bf16 + h_dim * C * bf16 + 128 * f32
    scratch = TQ * h_dim * bf16 + TQ * h_dim * f32 + 2 * TQ * 128 * f32
    temps = 4 * TQ * TK * f32 + TK * 2 * h_dim * (bf16 + f32)         # s/p temporaries + kv
    est = blocks + weights + scratch + temps
    return int(min(max(2 * est, 32 << 20), 64 << 20))


def attention_forward(x_ncl, params, *, heads, dim_head,
                      q_tile=None, kv_tile=None, exp_bf16=False):
    """x_ncl: (N, C, L) float32. params from prepare_attention_params. Returns (N, C, L)."""
    wq, wkv, wo, b = params
    N, C, L = x_ncl.shape
    h_dim = heads * dim_head
    TQ = q_tile or _pick_q_tile(L, N)
    TK = kv_tile or _pick_kv_tile(L)
    assert L % TQ == 0 and L % TK == 0

    # channels-last + bf16 so the 1x1 convs are plain (L,C)@(C,·) MXU matmuls and
    # the per-step re-fetched kv tiles cost half the HBM traffic.
    x = jnp.transpose(x_ncl, (0, 2, 1)).astype(jnp.bfloat16)   # (N, L, C)

    kernel = partial(_fused_attention_kernel, heads, dim_head, exp_bf16)
    const2 = lambda n, qi, ki: (0, 0)

    out_nlc = pl.pallas_call(
        kernel,
        out_shape=jax.ShapeDtypeStruct((N, L, C), x_ncl.dtype),
        grid=(N, L // TQ, L // TK),
        in_specs=[
            pl.BlockSpec((1, TQ, C), lambda n, qi, ki: (n, qi, 0)),   # x rows for Q
            pl.BlockSpec((1, TK, C), lambda n, qi, ki: (n, ki, 0)),   # x rows for K/V
            pl.BlockSpec((C, h_dim), const2),                         # Wq (scaled)
            pl.BlockSpec((C, 2 * h_dim), const2),                     # [Wk | Wv]
            pl.BlockSpec((h_dim, C), const2),                         # Wout
            pl.BlockSpec((1, C), const2),                             # bias
        ],
        out_specs=pl.BlockSpec((1, TQ, C), lambda n, qi, ki: (n, qi, 0)),
        scratch_shapes=[
            pltpu.VMEM((TQ, h_dim), jnp.bfloat16),   # cached q tile (lane-dense)
            pltpu.VMEM((TQ, heads), jnp.float32),    # running max (one lane / head)
            pltpu.VMEM((TQ, heads), jnp.float32),    # running sum
            pltpu.VMEM((TQ, h_dim), jnp.float32),    # running accumulator (lane-dense)
        ],
        compiler_params=pltpu.CompilerParams(
            dimension_semantics=("parallel", "parallel", "arbitrary"),
            vmem_limit_bytes=_vmem_limit_bytes(C, TQ, TK, heads, dim_head),
        ),
    )(x, x, wq, wkv, wo, b)

    return jnp.transpose(out_nlc, (0, 2, 1))                   # back to (N, C, L)


# ---------------- pure-JAX reference (for verification) ----------------

def attention_reference(x_ncl, w_qkv, w_out, b_out, *, heads, dim_head):
    N, C, L = x_ncl.shape
    h_dim = heads * dim_head
    xt = jnp.transpose(x_ncl, (0, 2, 1))                       # (N, L, C)
    qkv = (xt @ w_qkv).reshape(N, L, 3, heads, dim_head)
    q = jnp.transpose(qkv[:, :, 0], (0, 2, 1, 3)) * dim_head ** (-0.5)
    k = jnp.transpose(qkv[:, :, 1], (0, 2, 1, 3))
    v = jnp.transpose(qkv[:, :, 2], (0, 2, 1, 3))
    sim = jnp.einsum('nhid,nhjd->nhij', q, k)
    sim = sim - jnp.max(sim, axis=-1, keepdims=True)
    attn = jax.nn.softmax(sim, axis=-1)
    o = jnp.einsum('nhij,nhjd->nhid', attn, v)
    o = jnp.transpose(o, (0, 2, 1, 3)).reshape(N, L, h_dim)
    y = o @ w_out + b_out
    return jnp.transpose(y, (0, 2, 1))


# ---------------- main ----------------

if __name__ == "__main__":
    # small shapes consistent with the module: Attention(dim=8, heads=2, dim_head=8)
    N, C, L = 2, 8, 16
    heads, dim_head = 2, 8
    h_dim = heads * dim_head

    key = jax.random.PRNGKey(0)
    kx, kq, kw, kb = jax.random.split(key, 4)

    x = jax.random.normal(kx, (N, C, L), dtype=jnp.float32)
    # synthetic parameters (shapes mirror the nn.Conv1d weights, stored transposed
    # for channels-last matmul):
    #   to_qkv.weight: (3*h_dim, C, 1) -> w_qkv: (C, 3*h_dim)
    #   to_out.weight: (C, h_dim, 1)   -> w_out: (h_dim, C), b_out: (C,)
    w_qkv = 0.1 * jax.random.normal(kq, (C, 3 * h_dim), dtype=jnp.float32)
    w_out = 0.1 * jax.random.normal(kw, (h_dim, C), dtype=jnp.float32)
    b_out = 0.1 * jax.random.normal(kb, (C,), dtype=jnp.float32)

    params = prepare_attention_params(w_qkv, w_out, b_out,
                                      heads=heads, dim_head=dim_head)

    out = attention_forward(x, params, heads=heads, dim_head=dim_head)
    out = jax.block_until_ready(out)

    ref = attention_reference(x, w_qkv, w_out, b_out, heads=heads, dim_head=dim_head)
    assert out.shape == (N, C, L), out.shape
    # bf16 MXU inputs with f32 accumulation + approx reciprocal -> loosened tolerance
    max_err = float(jnp.max(jnp.abs(out - ref)))
    assert jnp.allclose(out, ref, atol=2e-2, rtol=2e-2), f"mismatch vs reference (max abs err {max_err})"

    print("KERNEL_OK")
</pallas_src>

<mosaic_0001>
module attributes {stable_mosaic.version = 11 : i64} {
  func.func @_fused_attention_kernel(%arg0: i32, %arg1: i32, %arg2: i32, %arg3: memref<1x16x8xbf16, #tpu.memory_space<vmem>>, %arg4: memref<1x16x8xbf16, #tpu.memory_space<vmem>>, %arg5: memref<8x16xbf16, #tpu.memory_space<vmem>>, %arg6: memref<8x32xbf16, #tpu.memory_space<vmem>>, %arg7: memref<16x8xbf16, #tpu.memory_space<vmem>>, %arg8: memref<1x8xf32, #tpu.memory_space<vmem>>, %arg9: memref<1x16x8xf32, #tpu.memory_space<vmem>>, %arg10: memref<16x16xbf16, #tpu.memory_space<vmem>>, %arg11: memref<16x2xf32, #tpu.memory_space<vmem>>, %arg12: memref<16x2xf32, #tpu.memory_space<vmem>>, %arg13: memref<16x16xf32, #tpu.memory_space<vmem>>) attributes {dimension_semantics = [#tpu.dimension_semantics<parallel>, #tpu.dimension_semantics<parallel>, #tpu.dimension_semantics<arbitrary>], iteration_bounds = array<i64: 2, 1, 1>, scalar_prefetch = 0 : i64, scratch_operands = 4 : i64, tpu.core_type = #tpu.core_type<tc>, window_params = [{transform_indices = @transform_0, window_bounds = array<i64: 1, 16, 8>}, {transform_indices = @transform_1, window_bounds = array<i64: 1, 16, 8>}, {pipeline_mode = #tpu.pipeline_mode<synchronous>, transform_indices = @transform_2, window_bounds = array<i64: 8, 16>}, {pipeline_mode = #tpu.pipeline_mode<synchronous>, transform_indices = @transform_3, window_bounds = array<i64: 8, 32>}, {pipeline_mode = #tpu.pipeline_mode<synchronous>, transform_indices = @transform_4, window_bounds = array<i64: 16, 8>}, {pipeline_mode = #tpu.pipeline_mode<synchronous>, transform_indices = @transform_5, window_bounds = array<i64: 1, 8>}, {transform_indices = @transform_6, window_bounds = array<i64: 1, 16, 8>}]} {
    %c0_i32 = arith.constant 0 : i32
    %0 = arith.cmpi eq, %arg2, %c0_i32 : i32
    %1 = arith.extui %0 : i1 to i32
    %c0_i32_0 = arith.constant 0 : i32
    %2 = arith.cmpi ne, %1, %c0_i32_0 : i32
    scf.if %2 {
      %c0_29 = arith.constant 0 : index
      %c0_30 = arith.constant 0 : index
      %c0_31 = arith.constant 0 : index
      %68 = vector.load %arg3[%c0_29, %c0_30, %c0_31] : memref<1x16x8xbf16, #tpu.memory_space<vmem>>, vector<1x16x8xbf16>
      %69 = vector.shape_cast %68 : vector<1x16x8xbf16> to vector<16x8xbf16>
      %c0_32 = arith.constant 0 : index
      %c0_33 = arith.constant 0 : index
      %70 = vector.load %arg5[%c0_32, %c0_33] : memref<8x16xbf16, #tpu.memory_space<vmem>>, vector<8x16xbf16>
      %cst_34 = arith.constant dense<0.000000e+00> : vector<16x16xf32>
      %71 = tpu.matmul %69, %70, %cst_34 {dimension_numbers = #tpu.dot_dimension_numbers<[1], [0], [0], [1], [0, 0, 1, 1], [], []>} : vector<16x8xbf16>, vector<8x16xbf16>, vector<16x16xf32> -> vector<16x16xf32>
      %72 = arith.truncf %71 : vector<16x16xf32> to vector<16x16xbf16>
      %c0_35 = arith.constant 0 : index
      %c0_36 = arith.constant 0 : index
      %73 = vector.load %arg10[%c0_35, %c0_36] : memref<16x16xbf16, #tpu.memory_space<vmem>>, vector<16x16xbf16>
      tpu.vector_store %arg10[%c0_35, %c0_36], %72 {strides = array<i32>} : memref<16x16xbf16, #tpu.memory_space<vmem>>, vector<16x16xbf16>,
      %cst_37 = arith.constant 0xFF800000 : f32
      %74 = vector.broadcast %cst_37 : f32 to vector<16x2xf32>
      %c0_38 = arith.constant 0 : index
      %c0_39 = arith.constant 0 : index
      %75 = vector.load %arg11[%c0_38, %c0_39] : memref<16x2xf32, #tpu.memory_space<vmem>>, vector<16x2xf32>
      tpu.vector_store %arg11[%c0_38, %c0_39], %74 {strides = array<i32>} : memref<16x2xf32, #tpu.memory_space<vmem>>, vector<16x2xf32>,
      %cst_40 = arith.constant 0.000000e+00 : f32
      %76 = vector.broadcast %cst_40 : f32 to vector<16x2xf32>
      %c0_41 = arith.constant 0 : index
      %c0_42 = arith.constant 0 : index
      %77 = vector.load %arg12[%c0_41, %c0_42] : memref<16x2xf32, #tpu.memory_space<vmem>>, vector<16x2xf32>
      tpu.vector_store %arg12[%c0_41, %c0_42], %76 {strides = array<i32>} : memref<16x2xf32, #tpu.memory_space<vmem>>, vector<16x2xf32>,
      %cst_43 = arith.constant 0.000000e+00 : f32
      %78 = vector.broadcast %cst_43 : f32 to vector<16x16xf32>
      %c0_44 = arith.constant 0 : index
      %c0_45 = arith.constant 0 : index
      %79 = vector.load %arg13[%c0_44, %c0_45] : memref<16x16xf32, #tpu.memory_space<vmem>>, vector<16x16xf32>
      tpu.vector_store %arg13[%c0_44, %c0_45], %78 {strides = array<i32>} : memref<16x16xf32, #tpu.memory_space<vmem>>, vector<16x16xf32>,
    } else {
    }
    %c0 = arith.constant 0 : index
    %c0_1 = arith.constant 0 : index
    %c0_2 = arith.constant 0 : index
    %3 = vector.load %arg4[%c0, %c0_1, %c0_2] : memref<1x16x8xbf16, #tpu.memory_space<vmem>>, vector<1x16x8xbf16>
    %4 = vector.shape_cast %3 : vector<1x16x8xbf16> to vector<16x8xbf16>
    %c0_3 = arith.constant 0 : index
    %c0_4 = arith.constant 0 : index
    %5 = vector.load %arg6[%c0_3, %c0_4] : memref<8x32xbf16, #tpu.memory_space<vmem>>, vector<8x32xbf16>
    %cst = arith.constant dense<0.000000e+00> : vector<16x32xf32>
    %6 = tpu.matmul %4, %5, %cst {dimension_numbers = #tpu.dot_dimension_numbers<[1], [0], [0], [1], [0, 0, 1, 1], [], []>} : vector<16x8xbf16>, vector<8x32xbf16>, vector<16x32xf32> -> vector<16x32xf32>
    %7 = arith.truncf %6 : vector<16x32xf32> to vector<16x32xbf16>
    %c0_5 = arith.constant 0 : index
    %c0_6 = arith.constant 0 : index
    %8 = vector.load %arg10[%c0_5, %c0_6] : memref<16x16xbf16, #tpu.memory_space<vmem>>, vector<16x16xbf16>
    %c0_7 = arith.constant 0 : index
    %c0_8 = arith.constant 0 : index
    %9 = vector.load %arg11[%c0_7, %c0_8] : memref<16x2xf32, #tpu.memory_space<vmem>>, vector<16x2xf32>
    %c0_9 = arith.constant 0 : index
    %c0_10 = arith.constant 0 : index
    %10 = vector.load %arg12[%c0_9, %c0_10] : memref<16x2xf32, #tpu.memory_space<vmem>>, vector<16x2xf32>
    %11 = vector.extract_strided_slice %8 {offsets = [0, 0], sizes = [16, 8], strides = [1, 1]} : vector<16x16xbf16> to vector<16x8xbf16>
    %12 = vector.extract_strided_slice %7 {offsets = [0, 0], sizes = [16, 8], strides = [1, 1]} : vector<16x32xbf16> to vector<16x8xbf16>
    %13 = vector.extract_strided_slice %7 {offsets = [0, 16], sizes = [16, 8], strides = [1, 1]} : vector<16x32xbf16> to vector<16x8xbf16>
    %cst_11 = arith.constant dense<0.000000e+00> : vector<16x16xf32>
    %14 = tpu.matmul %11, %12, %cst_11 {dimension_numbers = #tpu.dot_dimension_numbers<[1], [1], [0], [0], [0, 0, 1, 0], [], []>} : vector<16x8xbf16>, vector<16x8xbf16>, vector<16x16xf32> -> vector<16x16xf32>
    %15 = vector.extract_strided_slice %9 {offsets = [0, 0], sizes = [16, 1], strides = [1, 1]} : vector<16x2xf32> to vector<16x1xf32>
    %cst_12 = arith.constant dense<0xFF800000> : vector<16xf32>
    %16 = vector.multi_reduction <maximumf>, %14, %cst_12 [1] : vector<16x16xf32> to vector<16xf32>
    %17 = vector.shape_cast %16 : vector<16xf32> to vector<16x1xf32>
    %18 = arith.maximumf %15, %17 : vector<16x1xf32>
    %19 = arith.subf %15, %18 : vector<16x1xf32>
    %20 = math.exp %19 : vector<16x1xf32>
    %21 = vector.broadcast %18 : vector<16x1xf32> to vector<16x16xf32>
    %22 = arith.subf %14, %21 : vector<16x16xf32>
    %23 = math.exp %22 : vector<16x16xf32>
    %24 = vector.extract_strided_slice %10 {offsets = [0, 0], sizes = [16, 1], strides = [1, 1]} : vector<16x2xf32> to vector<16x1xf32>
    %25 = arith.mulf %20, %24 : vector<16x1xf32>
    %cst_13 = arith.constant dense<0.000000e+00> : vector<16xf32>
    %26 = vector.multi_reduction <add>, %23, %cst_13 [1] : vector<16x16xf32> to vector<16xf32>
    %27 = vector.shape_cast %26 : vector<16xf32> to vector<16x1xf32>
    %28 = arith.addf %25, %27 : vector<16x1xf32>
    %29 = arith.truncf %23 : vector<16x16xf32> to vector<16x16xbf16>
    %cst_14 = arith.constant dense<0.000000e+00> : vector<16x8xf32>
    %30 = tpu.matmul %29, %13, %cst_14 {dimension_numbers = #tpu.dot_dimension_numbers<[1], [0], [0], [1], [0, 0, 1, 1], [], []>} : vector<16x16xbf16>, vector<16x8xbf16>, vector<16x8xf32> -> vector<16x8xf32>
    %31 = vector.extract_strided_slice %8 {offsets = [0, 8], sizes = [16, 8], strides = [1, 1]} : vector<16x16xbf16> to vector<16x8xbf16>
    %32 = vector.extract_strided_slice %7 {offsets = [0, 8], sizes = [16, 8], strides = [1, 1]} : vector<16x32xbf16> to vector<16x8xbf16>
    %33 = vector.extract_strided_slice %7 {offsets = [0, 24], sizes = [16, 8], strides = [1, 1]} : vector<16x32xbf16> to vector<16x8xbf16>
    %cst_15 = arith.constant dense<0.000000e+00> : vector<16x16xf32>
    %34 = tpu.matmul %31, %32, %cst_15 {dimension_numbers = #tpu.dot_dimension_numbers<[1], [1], [0], [0], [0, 0, 1, 0], [], []>} : vector<16x8xbf16>, vector<16x8xbf16>, vector<16x16xf32> -> vector<16x16xf32>
    %35 = vector.extract_strided_slice %9 {offsets = [0, 1], sizes = [16, 1], strides = [1, 1]} : vector<16x2xf32> to vector<16x1xf32>
    %cst_16 = arith.constant dense<0xFF800000> : vector<16xf32>
    %36 = vector.multi_reduction <maximumf>, %34, %cst_16 [1] : vector<16x16xf32> to vector<16xf32>
    %37 = vector.shape_cast %36 : vector<16xf32> to vector<16x1xf32>
    %38 = arith.maximumf %35, %37 : vector<16x1xf32>
    %39 = arith.subf %35, %38 : vector<16x1xf32>
    %40 = math.exp %39 : vector<16x1xf32>
    %41 = vector.broadcast %38 : vector<16x1xf32> to vector<16x16xf32>
    %42 = arith.subf %34, %41 : vector<16x16xf32>
    %43 = math.exp %42 : vector<16x16xf32>
    %44 = vector.extract_strided_slice %10 {offsets = [0, 1], sizes = [16, 1], strides = [1, 1]} : vector<16x2xf32> to vector<16x1xf32>
    %45 = arith.mulf %40, %44 : vector<16x1xf32>
    %cst_17 = arith.constant dense<0.000000e+00> : vector<16xf32>
    %46 = vector.multi_reduction <add>, %43, %cst_17 [1] : vector<16x16xf32> to vector<16xf32>
    %47 = vector.shape_cast %46 : vector<16xf32> to vector<16x1xf32>
    %48 = arith.addf %45, %47 : vector<16x1xf32>
    %49 = arith.truncf %43 : vector<16x16xf32> to vector<16x16xbf16>
    %cst_18 = arith.constant dense<0.000000e+00> : vector<16x8xf32>
    %50 = tpu.matmul %49, %33, %cst_18 {dimension_numbers = #tpu.dot_dimension_numbers<[1], [0], [0], [1], [0, 0, 1, 1], [], []>} : vector<16x16xbf16>, vector<16x8xbf16>, vector<16x8xf32> -> vector<16x8xf32>
    %51 = tpu.concatenate %18, %38 in 1 : vector<16x1xf32>, vector<16x1xf32> -> vector<16x2xf32>
    %c0_19 = arith.constant 0 : index
    %c0_20 = arith.constant 0 : index
    %52 = vector.load %arg11[%c0_19, %c0_20] : memref<16x2xf32, #tpu.memory_space<vmem>>, vector<16x2xf32>
    tpu.vector_store %arg11[%c0_19, %c0_20], %51 {strides = array<i32>} : memref<16x2xf32, #tpu.memory_space<vmem>>, vector<16x2xf32>,
    %53 = tpu.concatenate %28, %48 in 1 : vector<16x1xf32>, vector<16x1xf32> -> vector<16x2xf32>
    %c0_21 = arith.constant 0 : index
    %c0_22 = arith.constant 0 : index
    %54 = vector.load %arg12[%c0_21, %c0_22] : memref<16x2xf32, #tpu.memory_space<vmem>>, vector<16x2xf32>
    tpu.vector_store %arg12[%c0_21, %c0_22], %53 {strides = array<i32>} : memref<16x2xf32, #tpu.memory_space<vmem>>, vector<16x2xf32>,
    %55 = vector.shape_cast %20 : vector<16x1xf32> to vector<16x1xf32>
    %56 = vector.broadcast %55 : vector<16x1xf32> to vector<16x8xf32>
    %57 = vector.shape_cast %40 : vector<16x1xf32> to vector<16x1xf32>
    %58 = vector.broadcast %57 : vector<16x1xf32> to vector<16x8xf32>
    %59 = tpu.concatenate %56, %58 in 1 : vector<16x8xf32>, vector<16x8xf32> -> vector<16x16xf32>
    %c0_23 = arith.constant 0 : index
    %c0_24 = arith.constant 0 : index
    %60 = vector.load %arg13[%c0_23, %c0_24] : memref<16x16xf32, #tpu.memory_space<vmem>>, vector<16x16xf32>
    %61 = arith.mulf %59, %60 : vector<16x16xf32>
    %62 = tpu.concatenate %30, %50 in 1 : vector<16x8xf32>, vector<16x8xf32> -> vector<16x16xf32>
    %63 = arith.addf %61, %62 : vector<16x16xf32>
    %c0_25 = arith.constant 0 : index
    %c0_26 = arith.constant 0 : index
    %64 = vector.load %arg13[%c0_25, %c0_26] : memref<16x16xf32, #tpu.memory_space<vmem>>, vector<16x16xf32>
    tpu.vector_store %arg13[%c0_25, %c0_26], %63 {strides = array<i32>} : memref<16x16xf32, #tpu.memory_space<vmem>>, vector<16x16xf32>,
    %c0_i32_27 = arith.constant 0 : i32
    %65 = arith.cmpi eq, %arg2, %c0_i32_27 : i32
    %66 = arith.extui %65 : i1 to i32
    %c0_i32_28 = arith.constant 0 : i32
    %67 = arith.cmpi ne, %66, %c0_i32_28 : i32
    scf.if %67 {
      %c0_29 = arith.constant 0 : index
      %c0_30 = arith.constant 0 : index
      %68 = vector.load %arg12[%c0_29, %c0_30] : memref<16x2xf32, #tpu.memory_space<vmem>>, vector<16x2xf32>
      %69 = tpu.reciprocal %68 {approx = true} : vector<16x2xf32> -> vector<16x2xf32>
      %70 = vector.extract_strided_slice %69 {offsets = [0, 0], sizes = [16, 1], strides = [1, 1]} : vector<16x2xf32> to vector<16x1xf32>
      %71 = vector.shape_cast %70 : vector<16x1xf32> to vector<16x1xf32>
      %72 = vector.broadcast %71 : vector<16x1xf32> to vector<16x8xf32>
      %73 = vector.extract_strided_slice %69 {offsets = [0, 1], sizes = [16, 1], strides = [1, 1]} : vector<16x2xf32> to vector<16x1xf32>
      %74 = vector.shape_cast %73 : vector<16x1xf32> to vector<16x1xf32>
      %75 = vector.broadcast %74 : vector<16x1xf32> to vector<16x8xf32>
      %76 = tpu.concatenate %72, %75 in 1 : vector<16x8xf32>, vector<16x8xf32> -> vector<16x16xf32>
      %c0_31 = arith.constant 0 : index
      %c0_32 = arith.constant 0 : index
      %77 = vector.load %arg13[%c0_31, %c0_32] : memref<16x16xf32, #tpu.memory_space<vmem>>, vector<16x16xf32>
      %78 = arith.mulf %77, %76 : vector<16x16xf32>
      %79 = arith.truncf %78 : vector<16x16xf32> to vector<16x16xbf16>
      %c0_33 = arith.constant 0 : index
      %c0_34 = arith.constant 0 : index
      %80 = vector.load %arg7[%c0_33, %c0_34] : memref<16x8xbf16, #tpu.memory_space<vmem>>, vector<16x8xbf16>
      %cst_35 = arith.constant dense<0.000000e+00> : vector<16x8xf32>
      %81 = tpu.matmul %79, %80, %cst_35 {dimension_numbers = #tpu.dot_dimension_numbers<[1], [0], [0], [1], [0, 0, 1, 1], [], []>} : vector<16x16xbf16>, vector<16x8xbf16>, vector<16x8xf32> -> vector<16x8xf32>
      %c0_36 = arith.constant 0 : index
      %c0_37 = arith.constant 0 : index
      %82 = vector.load %arg8[%c0_36, %c0_37] : memref<1x8xf32, #tpu.memory_space<vmem>>, vector<1x8xf32>
      %83 = vector.broadcast %82 : vector<1x8xf32> to vector<16x8xf32>
      %84 = arith.addf %81, %83 : vector<16x8xf32>
      %c0_38 = arith.constant 0 : index
      %c0_39 = arith.constant 0 : index
      %c0_40 = arith.constant 0 : index
      %85 = vector.load %arg9[%c0_38, %c0_39, %c0_40] : memref<1x16x8xf32, #tpu.memory_space<vmem>>, vector<1x16x8xf32>
      %86 = vector.shape_cast %85 : vector<1x16x8xf32> to vector<16x8xf32>
      %87 = vector.shape_cast %84 : vector<16x8xf32> to vector<1x16x8xf32>
      tpu.vector_store %arg9[%c0_38, %c0_39, %c0_40], %87 {strides = array<i32>} : memref<1x16x8xf32, #tpu.memory_space<vmem>>, vector<1x16x8xf32>,
    } else {
    }
    return
  }
  func.func @transform_0(%arg0: i32, %arg1: i32, %arg2: i32) -> (i32, i32, i32) {
    %c0_i32 = arith.constant 0 : i32
    %c0_i32_0 = arith.constant 0 : i32
    return %arg0, %arg1, %c0_i32 : i32, i32, i32
  }
  func.func @transform_1(%arg0: i32, %arg1: i32, %arg2: i32) -> (i32, i32, i32) {
    %c0_i32 = arith.constant 0 : i32
    %c0_i32_0 = arith.constant 0 : i32
    return %arg0, %arg2, %c0_i32 : i32, i32, i32
  }
  func.func @transform_2(%arg0: i32, %arg1: i32, %arg2: i32) -> (i32, i32) {
    %c0_i32 = arith.constant 0 : i32
    %c0_i32_0 = arith.constant 0 : i32
    %c0_i32_1 = arith.constant 0 : i32
    return %c0_i32, %c0_i32_0 : i32, i32
  }
  func.func @transform_3(%arg0: i32, %arg1: i32, %arg2: i32) -> (i32, i32) {
    %c0_i32 = arith.constant 0 : i32
    %c0_i32_0 = arith.constant 0 : i32
    %c0_i32_1 = arith.constant 0 : i32
    return %c0_i32, %c0_i32_0 : i32, i32
  }
  func.func @transform_4(%arg0: i32, %arg1: i32, %arg2: i32) -> (i32, i32) {
    %c0_i32 = arith.constant 0 : i32
    %c0_i32_0 = arith.constant 0 : i32
    %c0_i32_1 = arith.constant 0 : i32
    return %c0_i32, %c0_i32_0 : i32, i32
  }
  func.func @transform_5(%arg0: i32, %arg1: i32, %arg2: i32) -> (i32, i32) {
    %c0_i32 = arith.constant 0 : i32
    %c0_i32_0 = arith.constant 0 : i32
    %c0_i32_1 = arith.constant 0 : i32
    return %c0_i32, %c0_i32_0 : i32, i32
  }
  func.func @transform_6(%arg0: i32, %arg1: i32, %arg2: i32) -> (i32, i32, i32) {
    %c0_i32 = arith.constant 0 : i32
    %c0_i32_0 = arith.constant 0 : i32
    return %arg0, %arg1, %c0_i32 : i32, i32, i32
  }
}

</mosaic_0001>

<bundles_post_ra>
// kernel: tpu_custom_call.1
= control target key start
LH: loop header
LB: loop body
LE: loop exit
PB: predicated region body
PF: predicated region fallthrough
CT: control target
= control target key end

     0   :  { %s1214_s21 = smov 0   ;;  %s1216_s22 = smov 0   ;;  %s1366_s0 = inlined_call_operand.vmem [shape: bf16[2,16,8], index: 0, kind: input, shape index: {}]   ;;  %s1367_s1 = inlined_call_operand.vmem [shape: bf16[2,16,8], index: 1, kind: input, shape index: {}]   ;;  %s1368_s2 = inlined_call_operand.vmem [shape: bf16[8,16], index: 2, kind: input, shape index: {}]   ;;  %s1369_s3 = inlined_call_operand.vmem [shape: bf16[8,32], index: 3, kind: input, shape index: {}]   ;;  %s1370_s4 = inlined_call_operand.vmem [shape: bf16[16,8], index: 4, kind: input, shape index: {}]   ;;  %s1371_s5 = inlined_call_operand.vmem [shape: f32[1,8], index: 5, kind: input, shape index: {}]   ;;  %s1372_s6 = inlined_call_operand.vmem [shape: f32[2,16,8], index: 6, kind: output, shape index: {}]  }
   0x1   :  { %s1218_s23 = smov 0  }
   0x2 LB: > { %s35_s24 = sadd.s32 1, %s1164_s22  ;;  %p1001_p0 = scmp.ge.s32.totalorder %s1168_s23, 1  ;;  %s1168_s23 = sphi %s1218_s23, %s16_s23   ;;  %s1164_s22 = sphi %s1216_s22, %s1374_s22   ;;  %s1160_s21 = sphi %s1214_s21, %s1373_s21  }
   0x3   : > { %p37_p1 = scmp.ge.s32.totalorder %s35_s24, 2  ;;  %p257_p2 = scmp.lt.s32.totalorder %s1168_s23, 3 }
   0x5   : > { %s1376_s24 = smov (%p37_p1, %s35_s24), 0  ;;  %p258_p3 = pnand %p1001_p0, %p257_p2 }
   0x6   : > { %v341_v0 = vld [vmem:[%s1368_s2] sm:$0xf] (!%p258_p3)  ;;  %vm351_vm0 = vcmask (!%p258_p3), 1043456   ;;  %v1170_v2 = vmov (!%p258_p3), 0.0   ;;  %p305_p4 = scmp.lt.s32.totalorder (!%p258_p3), %s1160_s21, 1  ;;  %vm1171_vm1 = vmmov (!%p258_p3), 0  }
   0x7   : > { %261 = sbr.rel (%p258_p3) target bundleno = 1434 (0x59a), region = 44  ;;  %v408_v1 = vld [vmem:[%s1369_s3] sm:$0xf] (!%p258_p3)  ;;  %1038 = vmatprep.subr.bf16.mxu0 (!%p258_p3), %v1170_v2  ;;  %1044 = vmatprep.subr.bf16.mxu1 (!%p258_p3), %v1170_v2  ;;  %v353_v3 = vsel (!%p258_p3), %vm351_vm0, %v341_v0, 0  ;;  %vm347_vm2 = vcmask (!%p258_p3), 64512   ;;  %vm397_vm3 = vcmask (!%p258_p3), 130048  }
   0x8   : > { %v420_v4 = vsel (!%p258_p3), %vm351_vm0, %v408_v1, 0  ;;  %1039 = vmatpush3.bf16.msra.mxu0 (!%p258_p3), %v353_v3  ;;  %1040 = vmatprep.mubr.msk.bf16.mxu0 (!%p258_p3), %vm1171_vm1, %v1170_v2  ;;  %404 = vst.msk [vmem:[#allocation5] sm:$0xff] (!%p258_p3), %vm397_vm3, %v1170_v2  ;;  %405 = vst.msk [vmem:[#allocation5 + $0x8] sm:$0xff] (!%p258_p3), %vm397_vm3, %v1170_v2  ;;  %s1172_s12 = smov (!%p258_p3), 120   ;;  %vm399_vm4 = vcmask (!%p258_p3), 15360   ;;  %v1173_v28 = vmov (!%p258_p3), -inf  }
   0x9   : > { %1045 = vmatpush3.bf16.msra.mxu1 (!%p258_p3), %v420_v4  ;;  %1046 = vmatprep.mubr.msk.bf16.mxu1 (!%p258_p3), %vm1171_vm1, %v1170_v2  ;;  %400 = vst.msk [vmem:[#allocation3] sm:$0xff] (!%p258_p3), %vm399_vm4, %v1173_v28  ;;  %401 = vst.msk [vmem:[#allocation3 + $0x8] sm:$0xff] (!%p258_p3), %vm399_vm4, %v1173_v28  ;;  %v1174_v29 = vmov (!%p258_p3), 0   ;;  %s1175_s13 = smov (!%p258_p3), 112   ;;  %v1176_v42 = vmov (!%p258_p3), 1   ;;  %vm746_vm5 = vcmask (!%p258_p3), 7168  }
   0xa   : > { %1050 = vmatprep.subr.bf16.mxu0 (!%p258_p3), %v1170_v2  ;;  %1056 = vmatprep.subr.bf16.mxu1 (!%p258_p3), %v1170_v2  ;;  %402 = vst.msk [vmem:[#allocation4] sm:$0xff] (!%p258_p3), %vm399_vm4, %v1170_v2  ;;  %403 = vst.msk [vmem:[#allocation4 + $0x8] sm:$0xff] (!%p258_p3), %vm399_vm4, %v1170_v2  ;;  %s1177_s14 = smov (!%p258_p3), 104   ;;  %s1178_s17 = smov (!%p258_p3), 8  }
   0xb   : > { %1113 = vset.pattern.permute.xlu1 (!%p258_p3), %v1174_v29  ;;  %1116 = vset.pattern.permute.xlu0 (!%p258_p3), %v1174_v29 }
   0xe   : > { %s1378_s21 = smov (!%p305_p4, %s1160_s21), 1 }
   0xf   : > { %s1021_s29 = sshll.u32 %s1378_s21, 3  ;;  %s1023_s18 = sshll.u32 %s1378_s21, 4 }
  0x10   : > { %s312_s8 = scalar_lea.vmem %s1366_s0, %s1021_s29  ;;  %s322_s11 = scalar_lea.vmem %s1367_s1, %s1021_s29  ;;  %v1293_v36 = vld [vmem:[#allocation3] sm:$0xff]  ;;  %v1298_v39 = vld [vmem:[#allocation3 + $0x8] sm:$0xff] }
  0x11   : > { %v1123_v5 = vld [vmem:[%s312_s8] sm:$0xff]   ;;  %s332_s27 = scalar_lea.vmem %s1372_s6, %s1023_s18 }
  0x12   : > { %v1124_v6 = vld [vmem:[%s322_s11] sm:$0xff]   ;;  %1041 = vmatmul.mubr.msk.bf16.vlgmr.msra.gmra.mrb[0].mxu0 %vm347_vm2, %v1123_v5 }
  0x13   : > { %1047 = vmatmul.mubr.msk.bf16.vlgmr.msra.gmra.mrb[0].mxu1 %vm347_vm2, %v1124_v6  ;;  %1052 = vmatprep.mubr.msk.bf16.mxu0 %vm1171_vm1, %v1170_v2 }
  0x14   : > { %1058 = vmatprep.mubr.msk.bf16.mxu1 %vm1171_vm1, %v1170_v2 }
  0xe5   : > { %v389_v7 = vpop.f32.mrb[0].mxu0 }
  0xe6   : > { %v456_v8 = vpop.f32.mrb[0].mxu1  ;;  %v1042_v9 = vpop.f32.mrb[1].mxu0 }
  0xe7   : > { %v1048_v10 = vpop.f32.mrb[1].mxu1  ;;  %v392_v11 = vpop.f32.mrb[2].mxu0 }
  0xe8   : > { %v396_v12 = vpack.c.bf16 %v392_v11, %v389_v7  ;;  %v459_v13 = vpop.f32.mrb[2].mxu1  ;;  %v1043_v14 = vpop.f32.mrb[3].mxu0 }
  0xe9   : > { %v1265_v15 = vpack.c.bf16 %v459_v13, %v456_v8  ;;  %v1049_v16 = vpop.f32.mrb[3].mxu1 }
  0xea   : > { %398 = vst.msk [vmem:[#allocation2] sm:$0xff] %vm397_vm3, %v396_v12 }
  0xeb   : > { %609 = vrot.lane.b32.xlu0 %v1265_v15, %s1172_s12  ;;  %v473_v17 = vsel %vm347_vm2, %v1265_v15, 0 }
  0xec   : > { %1051 = vmatpush3.bf16.xpose.msra.mxu0 %v473_v17 }
  0xed   : > { %1062 = vmatprep.subr.bf16.mxu0 %v1170_v2 }
  0xf1   : > { %v464_v18 = vld [vmem:[#allocation2] sm:$0xff] }
  0xf2   : > { %607 = vrot.lane.b32.xlu0 %v464_v18, %s1172_s12 }
  0xf3   : > { %1053 = vmatmul.mubr.msk.bf16.vlgmr.msra.gmra.mrb[4].mxu0 %vm347_vm2, %v464_v18 }
  0xf4   : > { %1064 = vmatprep.mubr.msk.bf16.mxu0 %vm1171_vm1, %v1170_v2 }
 0x15d   : > { %v610_v19 = vpop.permute.xlu0 %609 }
 0x15e   : > { %v615_v20 = vsel %vm347_vm2, %v610_v19, 0 }
 0x15f   : > { %1063 = vmatpush3.bf16.xpose.msra.mxu0 %v615_v20 }
 0x160   : > { %1074 = vmatprep.subr.bf16.mxu0 %v1170_v2 }
 0x164   : > { %v608_v21 = vpop.permute.xlu0 %607 }
 0x166   : > { %1065 = vmatmul.mubr.msk.bf16.vlgmr.msra.gmra.mrb[8].mxu0 %vm347_vm2, %v608_v21 }
 0x167   : > { %1076 = vmatprep.mubr.msk.bf16.mxu0 %vm1171_vm1, %v1170_v2 }
 0x1c6   : > { %v509_v22 = vpop.f32.mrb[4].mxu0 }
 0x1c7   : > { %v1054_v23 = vpop.f32.mrb[5].mxu0  ;;  %v517_v24 = vsel %vm397_vm3, %v509_v22, -inf }
 0x1c8   : > { %518 = vmax.xlane.f32.xlu1 %v517_v24  ;;  %v512_v25 = vpop.f32.mrb[6].mxu0 }
 0x1c9   : > { %v1055_v26 = vpop.f32.mrb[7].mxu0  ;;  %v520_v27 = vsel %vm397_vm3, %v512_v25, -inf }
 0x1cc   : > { %521 = vmax.xlane.f32.xlu1 %v520_v27 }
 0x239   : > { %v651_v30 = vpop.f32.mrb[8].mxu0 }
 0x23a   : > { %v1066_v31 = vpop.f32.mrb[9].mxu0  ;;  %v658_v32 = vsel %vm397_vm3, %v651_v30, -inf }
 0x23b   : > { %659 = vmax.xlane.f32.xlu0 %v658_v32  ;;  %v654_v33 = vpop.f32.mrb[10].mxu0 }
 0x23c   : > { %v1067_v34 = vpop.f32.mrb[11].mxu0  ;;  %v661_v35 = vsel %vm397_vm3, %v654_v33, -inf }
 0x23d   : > { %662 = vmax.xlane.f32.xlu1 %v661_v35 }
 0x251   : > { %559 = vrot.lane.b32.xlu0 %v1265_v15, %s1175_s13 }
 0x255   : > { %v519_v37 = vpop.xlane.xlu1 %518 }
 0x256   : > { %v1296_v38 = vmax.f32 %v1293_v36, %v519_v37 }
 0x258   : > { %533 = vperm.xlu1 %1113, %v1296_v38   ;;  %v525_v10 = vsub.f32 %v1293_v36, %v1296_v38 }
 0x259   : > { %v522_v40 = vpop.xlane.xlu1 %521 }
 0x25a   : > { %v524_v41 = vmax.f32 %v1298_v39, %v522_v40  ;;  %v527_v13 = vmul.f32 1.442695, %v525_v10 }
 0x25c   : > { %538 = vperm.xlu1 %1113, %v524_v41   ;;  %v526_v60 = vsub.f32 %v1298_v39, %v524_v41 }
 0x25e   : > { %v529_v61 = vmul.f32 1.442695, %v526_v60 }
 0x260   : > { %1114 = vset.pattern.permute.xlu1 %v1176_v42 }
 0x2c8   : > { %v660_v43 = vpop.xlane.xlu0 %659 }
 0x2c9   : > { %v664_v44 = vmax.f32 %v1293_v36, %v660_v43 }
 0x2ca   : > { %v663_v45 = vpop.xlane.xlu1 %662 }
 0x2cb   : > { %v747_v46 = vsel %vm746_vm5, %v1296_v38, %v664_v44  ;;  %v665_v47 = vmax.f32 %v1298_v39, %v663_v45  ;;  %674 = vperm.xlu1 %1114, %v664_v44   ;;  %v666_v14 = vsub.f32 %v1293_v36, %v664_v44 }
 0x2cc   : > { %750 = vst.msk [vmem:[#allocation3] sm:$0xff] %vm399_vm4, %v747_v46  ;;  %v560_v48 = vpop.permute.xlu0 %559 }
 0x2cd   : > { %v748_v49 = vsel %vm746_vm5, %v524_v41, %v665_v47  ;;  %1057 = vmatpush3.bf16.msra.mxu1 %v560_v48  ;;  %v667_v16 = vsub.f32 %v1298_v39, %v665_v47 }
 0x2ce   : > { %751 = vst.msk [vmem:[#allocation3 + $0x8] sm:$0xff] %vm399_vm4, %v748_v49  ;;  %1068 = vmatprep.subr.bf16.mxu1 %v1170_v2 }
 0x2cf   : > { %679 = vperm.xlu1 %1114, %v665_v47   ;;  %v670_v17 = vmul.f32 1.442695, %v667_v16  ;;  %v1125_v47 = vld [vmem:[%s1370_s4] sm:$0xff]  }
 0x2d0   : > { %1075 = vmatpush3.bf16.msra.mxu0 %v1125_v47 }
 0x2d3   : > { %699 = vrot.lane.b32.xlu1 %v1265_v15, %s1177_s14  ;;  %v668_v15 = vmul.f32 1.442695, %v666_v14 }
 0x2d4   : > { %1115 = vset.pattern.permute.xlu1 %v1174_v29 }
 0x2d7   : > { %v534_v50 = vpop.permute.xlu1 %533 }
 0x2d8   : > { %v541_v51 = vsub.f32 %v509_v22, %v534_v50 }
 0x2da   : > { %v543_v52 = vmul.f32 1.442695, %v541_v51 }
 0x2db   : > { %v539_v53 = vpop.permute.xlu1 %538 }
 0x2dc   : > { %v542_v54 = vsub.f32 %v512_v25, %v539_v53  ;;  %1126 = vpow2.f32 %v543_v52  ;;  %v467_v25 = vld [vmem:[#allocation4] sm:$0xff] }
 0x2de   : > { %v545_v55 = vmul.f32 1.442695, %v542_v54 }
 0x2e0   : > { %1128 = vpow2.f32 %v545_v55 }
 0x2e1   : > { %1130 = vpow2.f32 %v529_v61  ;;  %v779_v61 = vld [vmem:[#allocation5 + $0x8] sm:$0xff] }
 0x2e6   : > { %v1127_v56 = vpop.eup %1126 }
 0x2e7   : > { %v549_v62 = vsel %vm397_vm3, %v1127_v56, 0.0 }
 0x2ea   : > { %v1129_v57 = vpop.eup %1128 }
 0x2eb   : > { %v552_v58 = vsel %vm397_vm3, %v1129_v57, 0.0  ;;  %v557_v59 = vpack.c.bf16 %v1129_v57, %v1127_v56  ;;  %v1131_v63 = vpop.eup %1130 }
 0x2ec   : > { %553 = vadd.xlane.f32.xlu0 %v552_v58 }
 0x2ed   : > { %1059 = vmatmul.mubr.msk.bf16.vlgmr.msra.gmra.mrb[4].mxu1 %vm397_vm3, %v557_v59 }
 0x2ee   : > { %1070 = vmatprep.mubr.msk.bf16.mxu1 %vm1171_vm1, %v1170_v2 }
 0x2f7   : > { %550 = vadd.xlane.f32.xlu1 %v549_v62 }
 0x302   : > { %763 = vperm.xlu0 %1116, %v1131_v63  }
 0x306   : > { %1122 = vset.pattern.permute.xlu0 %v1176_v42 }
 0x34a   : > { %v675_v0 = vpop.permute.xlu1 %674 }
 0x34b   : > { %v682_v1 = vsub.f32 %v651_v30, %v675_v0  ;;  %v468_v30 = vld [vmem:[#allocation4 + $0x8] sm:$0xff] }
 0x34c   : > { %v548_v35 = vmul.f32 %v1131_v63, %v468_v30 }
 0x34d   : > { %v684_v3 = vmul.f32 1.442695, %v682_v1 }
 0x34e   : > { %v680_v4 = vpop.permute.xlu1 %679 }
 0x34f   : > { %1132 = vpow2.f32 %v684_v3  ;;  %v683_v5 = vsub.f32 %v654_v33, %v680_v4 }
 0x351   : > { %v686_v6 = vmul.f32 1.442695, %v683_v5 }
 0x352   : > { %v700_v7 = vpop.permute.xlu1 %699 }
 0x353   : > { %1134 = vpow2.f32 %v686_v6  ;;  %1069 = vmatpush3.bf16.msra.mxu1 %v700_v7 }
 0x354   : > { %1136 = vpow2.f32 %v527_v13  ;;  %v1016_v13 = vld [vmem:[%s1371_s5] ss:$0 sm:$0xff] }
 0x355   : > { %1138 = vpow2.f32 %v668_v15 }
 0x356   : > { %1140 = vpow2.f32 %v670_v17 }
 0x359   : > { %v1133_v2 = vpop.eup %1132 }
 0x35a   : > { %v690_v8 = vsel %vm397_vm3, %v1133_v2, 0.0 }
 0x35b   : > { %691 = vadd.xlane.f32.xlu1 %v690_v8 }
 0x35d   : > { %v1135_v9 = vpop.eup %1134 }
 0x35e   : > { %v693_v11 = vsel %vm397_vm3, %v1135_v9, 0.0  ;;  %v698_v12 = vpack.c.bf16 %v1135_v9, %v1133_v2  ;;  %v1137_v18 = vpop.eup %1136 }
 0x35f   : > { %694 = vadd.xlane.f32.xlu1 %v693_v11  ;;  %v1139_v19 = vpop.eup %1138  ;;  %v547_v27 = vmul.f32 %v1137_v18, %v467_v25 }
 0x360   : > { %1071 = vmatmul.mubr.msk.bf16.vlgmr.msra.gmra.mrb[8].mxu1 %vm397_vm3, %v698_v12  ;;  %v1141_v20 = vpop.eup %1140  ;;  %v688_v28 = vmul.f32 %v1139_v19, %v467_v25 }
 0x361   : > { %v689_v37 = vmul.f32 %v1141_v20, %v468_v30 }
 0x370   : > { %758 = vperm.xlu1 %1115, %v1137_v18  }
 0x374   : > { %1117 = vset.pattern.permute.xlu1 %v1176_v42 }
 0x375   : > { %768 = vperm.xlu1 %1117, %v1139_v19  }
 0x379   : > { %773 = vperm.xlu1 %1117, %v1141_v20   ;;  %v554_v34 = vpop.xlane.xlu0 %553 }
 0x37a   : > { %v556_v39 = vadd.f32 %v554_v34, %v548_v35 }
 0x37d   : > { %1118 = vset.pattern.permute.xlu1 %v1174_v29 }
 0x381   : > { %v764_v58 = vpop.permute.xlu0 %763 }
 0x384   : > { %v551_v26 = vpop.xlane.xlu1 %550 }
 0x385   : > { %v555_v32 = vadd.f32 %v551_v26, %v547_v27 }
 0x3c0   : > { %v599_v21 = vpop.f32.mrb[4].mxu1 }
 0x3c1   : > { %v1060_v22 = vpop.f32.mrb[5].mxu1 }
 0x3c2   : > { %v602_v23 = vpop.f32.mrb[6].mxu1 }
 0x3c3   : > { %v1061_v24 = vpop.f32.mrb[7].mxu1 }
 0x3e8   : > { %v692_v31 = vpop.xlane.xlu1 %691 }
 0x3e9   : > { %v696_v33 = vadd.f32 %v692_v31, %v688_v28 }
 0x3eb   : > { %v752_v36 = vsel %vm746_vm5, %v555_v32, %v696_v33 }
 0x3ec   : > { %754 = vst.msk [vmem:[#allocation4] sm:$0xff] %vm399_vm4, %v752_v36  ;;  %v695_v38 = vpop.xlane.xlu1 %694 }
 0x3ed   : > { %v697_v40 = vadd.f32 %v695_v38, %v689_v37 }
 0x3ef   : > { %v753_v41 = vsel %vm746_vm5, %v556_v39, %v697_v40 }
 0x3f0   : > { %755 = vst.msk [vmem:[#allocation4 + $0x8] sm:$0xff] %vm399_vm4, %v753_v41  ;;  %v759_v52 = vpop.permute.xlu1 %758 }
 0x3f3   : > { %v799_v43 = vld [vmem:[#allocation4] sm:$0xff] }
 0x3f4   : > { %1142 = vrcp.f32 %v799_v43  ;;  %v769_v53 = vpop.permute.xlu1 %768 }
 0x3f5   : > { %v776_v57 = vsel %vm347_vm2, %v759_v52, %v769_v53 }
 0x3f7   : > { %v800_v44 = vld [vmem:[#allocation4 + $0x8] sm:$0xff] }
 0x3f8   : > { %1144 = vrcp.f32 %v800_v44  ;;  %v774_v54 = vpop.permute.xlu1 %773 }
 0x3f9   : > { %v777_v62 = vsel %vm347_vm2, %v764_v58, %v774_v54 }
 0x3fa   : > { %v781_v1 = vmul.f32 %v779_v61, %v777_v62 }
 0x3fe   : > { %v1143_v45 = vpop.eup %1142 }
 0x3ff   : > { %805 = vperm.xlu1 %1118, %v1143_v45  }
 0x402   : > { %v1145_v46 = vpop.eup %1144 }
 0x403   : > { %1119 = vset.pattern.permute.xlu1 %v1176_v42 }
 0x404   : > { %814 = vperm.xlu1 %1119, %v1143_v45  }
 0x408   : > { %1120 = vset.pattern.permute.xlu1 %v1174_v29 }
 0x409   : > { %810 = vperm.xlu1 %1120, %v1145_v46  }
 0x40d   : > { %1121 = vset.pattern.permute.xlu1 %v1176_v42  ;;  %v778_v42 = vld [vmem:[#allocation5] sm:$0xff] }
 0x40e   : > { %v780_v59 = vmul.f32 %v778_v42, %v776_v57 }
 0x433   : > { %v739_v48 = vpop.f32.mrb[8].mxu1 }
 0x434   : > { %v1072_v49 = vpop.f32.mrb[9].mxu1  ;;  %784 = vrot.lane.b32.xlu1 %v739_v48, %s1178_s17 }
 0x435   : > { %v742_v50 = vpop.f32.mrb[10].mxu1 }
 0x436   : > { %v1073_v51 = vpop.f32.mrb[11].mxu1 }
 0x438   : > { %786 = vrot.lane.b32.xlu1 %v742_v50, %s1178_s17 }
 0x43c   : > { %818 = vperm.xlu1 %1121, %v1145_v46  }
 0x47e   : > { %v806_v29 = vpop.permute.xlu1 %805 }
 0x483   : > { %v815_v55 = vpop.permute.xlu1 %814 }
 0x484   : > { %v821_v2 = vsel %vm347_vm2, %v806_v29, %v815_v55 }
 0x488   : > { %v811_v56 = vpop.permute.xlu1 %810 }
 0x4a6   : > { %v785_v60 = vpop.permute.xlu1 %784 }
 0x4a7   : > { %v790_v63 = vsel %vm347_vm2, %v599_v21, %v785_v60 }
 0x4a8   : > { %v792_v0 = vadd.f32 %v790_v63, %v780_v59 }
 0x4aa   : > { %794 = vst.msk [vmem:[#allocation5] sm:$0xff] %vm397_vm3, %v792_v0  ;;  %v787_v3 = vpop.permute.xlu1 %786 }
 0x4ab   : > { %v791_v4 = vsel %vm347_vm2, %v602_v23, %v787_v3 }
 0x4ac   : > { %v793_v5 = vadd.f32 %v791_v4, %v781_v1 }
 0x4ae   : > { %795 = vst.msk [vmem:[#allocation5 + $0x8] sm:$0xff] %vm397_vm3, %v793_v5 }
 0x4b1   : > { %v823_v6 = vld [vmem:[#allocation5] sm:$0xff] }
 0x4b2   : > { %v825_v10 = vmul.f32 %v823_v6, %v821_v2 }
 0x4b5   : > { %v824_v8 = vld [vmem:[#allocation5 + $0x8] sm:$0xff] }
 0x4bb   : > { %v819_v7 = vpop.permute.xlu1 %818 }
 0x4bc   : > { %v822_v9 = vsel %vm347_vm2, %v811_v56, %v819_v7 }
 0x4bd   : > { %v826_v11 = vmul.f32 %v824_v8, %v822_v9 }
 0x4bf   : > { %v827_v12 = vpack.c.bf16 %v826_v11, %v825_v10 }
 0x4c1   : > { %1077 = vmatmul.mubr.msk.bf16.vlgmr.msra.gmra.mrb[12].mxu0 %vm397_vm3, %v827_v12 }
 0x594   : > { %v880_v14 = vpop.f32.mrb[12].mxu0 }
 0x595   : > { %v881_v15 = vadd.f32 %v1016_v13, %v880_v14  ;;  %v1078_v16 = vpop.f32.mrb[13].mxu0 }
 0x596   : > { %v883_v17 = vpop.f32.mrb[14].mxu0 }
 0x597   : > { %887 = vst.msk [vmem:[%s332_s27] sm:$0xff] %vm347_vm2, %v881_v15  ;;  %v884_v18 = vadd.f32 %v1016_v13, %v883_v17  ;;  %v1079_v19 = vpop.f32.mrb[15].mxu0 }
 0x599   : > { %888 = vst.msk [vmem:[%s332_s27 + $0x8] sm:$0xff] %vm347_vm2, %v884_v18 }
 0x59a PF: > { %s16_s23 = sadd.s32 1, %s1168_s23   ;;  %s1373_s21 = smov %s1164_s22 }
 0x59b   : > { %p13_p5 = scmp.ge.s32.totalorder %s16_s23, 4   ;;  %s1374_s22 = smov %s1376_s24 }
 0x59d   :  { %15 = sbr.rel (!%p13_p5) target bundleno = 2 (0x2), region = 85 }

</bundles_post_ra>
